<compile_context>
chip_gen: v5e
topology: v5e:2x2
jax: 0.10.0
libtpu: 0.0.40
codegen_flags: <defaults>
</compile_context>

<pallas_src>
import functools

import numpy as np
import jax
import jax.numpy as jnp
from jax.experimental import pallas as pl
from jax.experimental.pallas import tpu as pltpu

_VMEM = pl.BlockSpec(memory_space=pltpu.MemorySpace.VMEM)
_DEFAULT = jax.lax.Precision.DEFAULT
_HIGHEST = jax.lax.Precision.HIGHEST


def _round_up(n, m):
    return ((n + m - 1) // m) * m


# ----------------------------- fused kernel ---------------------------------

def _make_decoder_kernel(cfg):
    """cfg holds only static Python ints (offsets/sizes into the two packed
    constant arrays), so the kernel body is fully unrolled at trace time."""

    def kernel(x_ref, mat_ref, vec_ref, o_ref):
        def mat(block):                       # static row-slice of matrix pack
            row, k, n = block
            return mat_ref[row:row + k, 0:n]

        def vec(row, n):                      # static row of the vector pack
            return vec_ref[row:row + 1, 0:n]

        batch = x_ref.shape[0]

        # (1) Linear + torch reshape(B, C0, H0, W0).  The weight columns were
        # pre-permuted to the kernel's (y, x, c) lane order, so ONE GEMM lands
        # the activation in its working layout: rows=batch, lanes=spatial*ch.
        h = jnp.dot(x_ref[...], mat(cfg["lin"]),
                    preferred_element_type=jnp.float32, precision=_DEFAULT)
        h = h + vec(cfg["lin_bias_row"], cfg["n0"])

        # (2) hidden blocks: Conv3x3 -> 2x nearest Upsample -> BN -> LeakyReLU.
        # The [upsample ->] conv is one dense prep-time-folded GEMM (no 0/1
        # selection matmuls, no im2col).  BN + LeakyReLU run at the
        # pre-upsample resolution, which is exact because integer-factor
        # nearest upsampling preserves per-channel batch mean/variance and
        # commutes with elementwise ops.  Hidden conv biases are omitted: a
        # per-channel constant cancels exactly in training-mode BatchNorm.
        for layer in cfg["layers"]:
            a = jnp.dot(h, mat(layer["M"]),
                        preferred_element_type=jnp.float32, precision=_DEFAULT)
            # Batch statistics: reduce over batch rows, then fold the spatial
            # positions per channel with a tiny 0/1 matrix.  These are 2-row
            # MXU pushes; HIGHEST keeps the gathers exact at negligible cost.
            colsum = jnp.sum(a, axis=0, keepdims=True)
            colsum2 = jnp.sum(a * a, axis=0, keepdims=True)
            sums = jnp.dot(jnp.concatenate([colsum, colsum2], axis=0),
                           mat(layer["ones"]),
                           preferred_element_type=jnp.float32,
                           precision=_HIGHEST)                      # (2, C)
            inv_n = 1.0 / float(batch * layer["S"])
            mean = sums[0:1, :] * inv_n
            var = sums[1:2, :] * inv_n - mean * mean                # biased var
            scale = vec(layer["gamma_row"], layer["C"]) * jax.lax.rsqrt(var + 1e-5)
            shift = vec(layer["beta_row"], layer["C"]) - mean * scale
            sb = jnp.dot(jnp.concatenate([scale, shift], axis=0),
                         mat(layer["onesT"]),
                         preferred_element_type=jnp.float32,
                         precision=_HIGHEST)                        # (2, S*C)
            y = a * sb[0:1, :] + sb[1:2, :]
            h = jnp.where(y >= 0.0, y, 0.01 * y)                    # LeakyReLU

        # (3) output layer: folded [2x nearest up ->] Conv3x3 + bias + Sigmoid.
        # Output columns are CHANNEL-MAJOR (c, y, x) == flat NCHW, so the only
        # post-kernel op is a free metadata reshape and the HBM store is
        # exactly the useful extent.
        a = jnp.dot(h, mat(cfg["out"]),
                    preferred_element_type=jnp.float32, precision=_DEFAULT)
        a = a + vec(cfg["out_bias_row"], cfg["out_cols"])
        o_ref[...] = pl.reciprocal(1.0 + jnp.exp(-a), approx=True)  # sigmoid

    return kernel


def decoder_forward(x, mats, vecs, *, cfg):
    """x: (B, latent_dim) f32 -> (B, C_out, H_out, W_out) f32 (NCHW)."""
    batch = x.shape[0]
    out2d = pl.pallas_call(
        _make_decoder_kernel(cfg),
        out_shape=jax.ShapeDtypeStruct((batch, cfg["out_cols"]), jnp.float32),
        in_specs=[_VMEM, _VMEM, _VMEM],
        out_specs=_VMEM,
    )(x, mats, vecs)
    # Columns are already flat NCHW (c, y, x): reshape is metadata-only.
    return out2d.reshape(batch, cfg["out_channels"], cfg["out_h"], cfg["out_w"])


# ------------------------------ parameters ----------------------------------

def init_torch_params(key, latent_dim, hidden_dims, reshape, out_channels):
    """Random parameters in PyTorch layouts (Linear: (out,in); Conv: OIHW)."""
    c0, h0, w0 = reshape
    rprod = c0 * h0 * w0
    keys = iter(jax.random.split(key, 4 * len(hidden_dims) + 6))
    p = {"conv": []}
    if rprod != latent_dim:
        p["lin_w"] = 0.1 * jax.random.normal(next(keys), (rprod, latent_dim), jnp.float32)
        p["lin_b"] = 0.1 * jax.random.normal(next(keys), (rprod,), jnp.float32)
    else:                                  # nn.Identity path
        p["lin_w"] = None
        p["lin_b"] = None
    cin = c0
    for hdim in hidden_dims:
        p["conv"].append({
            "w": 0.1 * jax.random.normal(next(keys), (hdim, cin, 3, 3), jnp.float32),
            "b": 0.1 * jax.random.normal(next(keys), (hdim,), jnp.float32),
            "gamma": 1.0 + 0.1 * jax.random.normal(next(keys), (hdim,), jnp.float32),
            "beta": 0.1 * jax.random.normal(next(keys), (hdim,), jnp.float32),
        })
        cin = hdim
    p["out_w"] = 0.1 * jax.random.normal(next(keys), (out_channels, cin, 3, 3), jnp.float32)
    p["out_b"] = 0.1 * jax.random.normal(next(keys), (out_channels,), jnp.float32)
    return p


def _fold_conv_upsample(w_oihw, h_in, w_in, up, out_channel_major=False):
    """Fold [nearest-`up` upsample ->] 3x3 conv (pad=1) into one dense GEMM
    matrix acting on the 'rows = batch, lanes = (y, x, c)' activation layout.
    Rows index the PRE-upsample input (yi, xi, ci); columns index the conv
    output (yo, xo, co), or (co, yo, xo) if out_channel_major.  Completely
    batch-independent."""
    w = np.asarray(w_oihw, np.float32)                  # (cout, cin, 3, 3)
    cout, cin = w.shape[0], w.shape[1]
    ho, wo = up * h_in, up * w_in
    m = np.zeros((h_in * w_in * cin, ho * wo * cout), np.float32)
    for yo in range(ho):
        for xo in range(wo):
            s_out = yo * wo + xo
            for ky in range(3):
                for kx in range(3):
                    yy, xx = yo + ky - 1, xo + kx - 1
                    if not (0 <= yy < ho and 0 <= xx < wo):
                        continue
                    s_in = (yy // up) * w_in + (xx // up)
                    for co in range(cout):
                        col = (co * ho * wo + s_out) if out_channel_major \
                              else (s_out * cout + co)
                        m[s_in * cin:(s_in + 1) * cin, col] += w[co, :, ky, kx]
    return m


def prepare_kernel_params(tp, latent_dim, reshape, out_channels, output_hw):
    """Bake torch-layout params into two packed, tile-friendly constant arrays
    (one matrix pack, one row-vector pack) plus a static-offset config dict.
    Nothing here depends on the batch size."""
    c0, h0, w0 = reshape
    s0 = h0 * w0
    n0 = s0 * c0

    mat_entries, row_cursor = [], [0]

    def add_mat(m):
        m = np.asarray(m, np.float32)
        r = row_cursor[0]
        mat_entries.append((r, m))
        row_cursor[0] = r + _round_up(m.shape[0], 8)     # keep offsets 8-aligned
        return (int(r), int(m.shape[0]), int(m.shape[1]))

    vec_entries = []

    def add_vec(v):
        vec_entries.append(np.asarray(v, np.float32).reshape(-1))
        return len(vec_entries) - 1

    # --- Linear: columns permuted from torch's (c, y, x)-flat order to (y, x, c)
    if tp["lin_w"] is not None:
        wt = np.asarray(tp["lin_w"], np.float32)          # (n0, latent)
        bt = np.asarray(tp["lin_b"], np.float32)
        assert wt.shape == (n0, latent_dim)
    else:                                                 # nn.Identity path
        wt = np.eye(n0, dtype=np.float32)
        bt = np.zeros((n0,), np.float32)
    w_lin = wt.reshape(c0, s0, wt.shape[1]).transpose(2, 1, 0).reshape(wt.shape[1], n0)
    b_lin = bt.reshape(c0, s0).T.reshape(-1)

    cfg = {"lin": add_mat(w_lin), "lin_bias_row": add_vec(b_lin), "n0": int(n0),
           "layers": []}

    # --- hidden blocks (conv biases intentionally dropped: they cancel in BN)
    cur_h, cur_w, cur_c = h0, w0, c0
    for i, layer in enumerate(tp["conv"]):
        up = 1 if i == 0 else 2                 # fold the PREVIOUS block's 2x up
        hdim = int(layer["w"].shape[0])
        m = _fold_conv_upsample(layer["w"], cur_h, cur_w, up)
        cur_h, cur_w, cur_c = up * cur_h, up * cur_w, hdim
        s = cur_h * cur_w
        ones_map = np.tile(np.eye(hdim, dtype=np.float32), (s, 1))   # (s*C, C)
        cfg["layers"].append({
            "M": add_mat(m),
            "ones": add_mat(ones_map),
            "onesT": add_mat(ones_map.T.copy()),
            "gamma_row": add_vec(layer["gamma"]),
            "beta_row": add_vec(layer["beta"]),
            "C": int(hdim), "S": int(s),
        })

    # --- output layer (channel-major columns == flat NCHW)
    out_h, out_w_sp = 2 * cur_h, 2 * cur_w
    # TODO(synk): spatial mismatch would insert a bilinear nn.Upsample - not implemented.
    assert (out_h, out_w_sp) == tuple(output_hw), "bilinear branch not supported"
    m_out = _fold_conv_upsample(tp["out_w"], cur_h, cur_w, 2, out_channel_major=True)
    out_cols = out_channels * out_h * out_w_sp
    out_bias = np.repeat(np.asarray(tp["out_b"], np.float32), out_h * out_w_sp)
    cfg.update({"out": add_mat(m_out), "out_bias_row": add_vec(out_bias),
                "out_cols": int(out_cols), "out_channels": int(out_channels),
                "out_h": int(out_h), "out_w": int(out_w_sp)})

    # --- pack everything into two arrays => 3 input DMAs total for the kernel
    mat_rows = row_cursor[0]
    mat_cols = max(m.shape[1] for _, m in mat_entries)
    mats = np.zeros((mat_rows, mat_cols), np.float32)
    for r, m in mat_entries:
        mats[r:r + m.shape[0], :m.shape[1]] = m
    vec_cols = max(v.size for v in vec_entries)
    vecs = np.zeros((_round_up(len(vec_entries), 8), vec_cols), np.float32)
    for i, v in enumerate(vec_entries):
        vecs[i, :v.size] = v
    return jnp.asarray(mats), jnp.asarray(vecs), cfg


# --------------------------- pure-JAX reference -----------------------------

def decoder_reference(x, tp, reshape):
    """Pure-JAX reference of the PyTorch Decoder.forward (training-mode BN)."""
    c0, h0, w0 = reshape
    batch = x.shape[0]
    if tp["lin_w"] is not None:
        h = jnp.dot(x, tp["lin_w"].T, precision=_HIGHEST) + tp["lin_b"]
    else:
        h = x
    h = h.reshape(batch, c0, h0, w0)
    for layer in tp["conv"]:
        h = jax.lax.conv_general_dilated(
            h, layer["w"], window_strides=(1, 1), padding=((1, 1), (1, 1)),
            dimension_numbers=("NCHW", "OIHW", "NCHW"), precision=_HIGHEST)
        h = h + layer["b"][None, :, None, None]
        h = jnp.repeat(jnp.repeat(h, 2, axis=2), 2, axis=3)     # nearest 2x up
        mean = jnp.mean(h, axis=(0, 2, 3), keepdims=True)
        var = jnp.mean(jnp.square(h - mean), axis=(0, 2, 3), keepdims=True)
        h = (h - mean) * jax.lax.rsqrt(var + 1e-5)
        h = h * layer["gamma"][None, :, None, None] + layer["beta"][None, :, None, None]
        h = jnp.where(h >= 0.0, h, 0.01 * h)
    h = jax.lax.conv_general_dilated(
        h, tp["out_w"], window_strides=(1, 1), padding=((1, 1), (1, 1)),
        dimension_numbers=("NCHW", "OIHW", "NCHW"), precision=_HIGHEST)
    h = h + tp["out_b"][None, :, None, None]
    return jax.nn.sigmoid(h)


# ---------------------------------- main -------------------------------------

if __name__ == "__main__":
    latent_dim = 32
    hidden_dims = (16, 8)
    reshape = (16, 2, 2)      # prod = 64 != 32  ->  nn.Linear(32, 64) prepended
    out_channels = 3          # output_shape = (3, 8, 8) -> no bilinear branch
    batch = 2
    out_hw = (reshape[1] * 2 ** len(hidden_dims),
              reshape[2] * 2 ** len(hidden_dims))

    key = jax.random.PRNGKey(0)
    k_x, k_p = jax.random.split(key)
    x = jax.random.normal(k_x, (batch, latent_dim), jnp.float32)

    tp = init_torch_params(k_p, latent_dim, hidden_dims, reshape, out_channels)
    mats, vecs, cfg = prepare_kernel_params(tp, latent_dim, reshape,
                                            out_channels, out_hw)

    fwd = jax.jit(functools.partial(decoder_forward, cfg=cfg))
    out = jax.block_until_ready(fwd(x, mats, vecs))

    assert out.shape == (batch, out_channels) + out_hw, out.shape
    assert out.dtype == jnp.float32
    assert bool(jnp.all(jnp.isfinite(out)))

    ref = jax.block_until_ready(decoder_reference(x, tp, reshape))
    err = float(jnp.max(jnp.abs(out - ref)))
    # Kernel weight GEMMs run at MXU DEFAULT (single-pass bf16) precision per
    # the perf review; the reference runs in f32/HIGHEST, so allow a small gap.
    assert err < 2e-2, f"mismatch vs pure-JAX reference: {err}"

    print("KERNEL_OK")
</pallas_src>

<mosaic_0001>
module attributes {stable_mosaic.version = 11 : i64} {
  func.func @kernel(%arg0: memref<2x32xf32, #tpu.memory_space<vmem>>, %arg1: memref<504x192xf32, #tpu.memory_space<vmem>>, %arg2: memref<8x192xf32, #tpu.memory_space<vmem>>, %arg3: memref<2x192xf32, #tpu.memory_space<vmem>>) attributes {dimension_semantics = [], scalar_prefetch = 0 : i64, scratch_operands = 0 : i64, tpu.core_type = #tpu.core_type<tc>} {
    %c0 = arith.constant 0 : index
    %c0_0 = arith.constant 0 : index
    %0 = vector.load %arg0[%c0, %c0_0] : memref<2x32xf32, #tpu.memory_space<vmem>>, vector<2x32xf32>
    %c0_1 = arith.constant 0 : index
    %c0_2 = arith.constant 0 : index
    %1 = vector.load %arg1[%c0_1, %c0_2] : memref<504x192xf32, #tpu.memory_space<vmem>>, vector<32x64xf32>
    %cst = arith.constant dense<0.000000e+00> : vector<2x64xf32>
    %2 = tpu.matmul %0, %1, %cst {dimension_numbers = #tpu.dot_dimension_numbers<[1], [0], [0], [1], [0, 0, 1, 1], [], []>} : vector<2x32xf32>, vector<32x64xf32>, vector<2x64xf32> -> vector<2x64xf32>
    %c0_3 = arith.constant 0 : index
    %c0_4 = arith.constant 0 : index
    %3 = vector.load %arg2[%c0_3, %c0_4] : memref<8x192xf32, #tpu.memory_space<vmem>>, vector<1x64xf32>
    %4 = vector.broadcast %3 : vector<1x64xf32> to vector<2x64xf32>
    %5 = arith.addf %2, %4 : vector<2x64xf32>
    %c32 = arith.constant 32 : index
    %c0_5 = arith.constant 0 : index
    %6 = vector.load %arg1[%c32, %c0_5] : memref<504x192xf32, #tpu.memory_space<vmem>>, vector<64x64xf32>
    %cst_6 = arith.constant dense<0.000000e+00> : vector<2x64xf32>
    %7 = tpu.matmul %5, %6, %cst_6 {dimension_numbers = #tpu.dot_dimension_numbers<[1], [0], [0], [1], [0, 0, 1, 1], [], []>} : vector<2x64xf32>, vector<64x64xf32>, vector<2x64xf32> -> vector<2x64xf32>
    %cst_7 = arith.constant dense<0.000000e+00> : vector<64xf32>
    %8 = vector.multi_reduction <add>, %7, %cst_7 [0] : vector<2x64xf32> to vector<64xf32>
    %9 = vector.shape_cast %8 : vector<64xf32> to vector<1x64xf32>
    %10 = arith.mulf %7, %7 : vector<2x64xf32>
    %cst_8 = arith.constant dense<0.000000e+00> : vector<64xf32>
    %11 = vector.multi_reduction <add>, %10, %cst_8 [0] : vector<2x64xf32> to vector<64xf32>
    %12 = vector.shape_cast %11 : vector<64xf32> to vector<1x64xf32>
    %13 = tpu.concatenate %9, %12 in 0 : vector<1x64xf32>, vector<1x64xf32> -> vector<2x64xf32>
    %c96 = arith.constant 96 : index
    %c0_9 = arith.constant 0 : index
    %14 = vector.load %arg1[%c96, %c0_9] : memref<504x192xf32, #tpu.memory_space<vmem>>, vector<64x16xf32>
    %cst_10 = arith.constant dense<0.000000e+00> : vector<2x16xf32>
    %15 = tpu.matmul %13, %14, %cst_10 {dimension_numbers = #tpu.dot_dimension_numbers<[1], [0], [0], [1], [0, 0, 1, 1], [], []>, precision = #tpu.contract_precision<fp32>} : vector<2x64xf32>, vector<64x16xf32>, vector<2x16xf32> -> vector<2x16xf32>
    %16 = vector.extract_strided_slice %15 {offsets = [0, 0], sizes = [1, 16], strides = [1, 1]} : vector<2x16xf32> to vector<1x16xf32>
    %cst_11 = arith.constant 1.250000e-01 : f32
    %17 = vector.broadcast %cst_11 : f32 to vector<1x16xf32>
    %18 = arith.mulf %16, %17 : vector<1x16xf32>
    %19 = vector.extract_strided_slice %15 {offsets = [1, 0], sizes = [1, 16], strides = [1, 1]} : vector<2x16xf32> to vector<1x16xf32>
    %cst_12 = arith.constant 1.250000e-01 : f32
    %20 = vector.broadcast %cst_12 : f32 to vector<1x16xf32>
    %21 = arith.mulf %19, %20 : vector<1x16xf32>
    %22 = arith.mulf %18, %18 : vector<1x16xf32>
    %23 = arith.subf %21, %22 : vector<1x16xf32>
    %c1 = arith.constant 1 : index
    %c0_13 = arith.constant 0 : index
    %24 = vector.load %arg2[%c1, %c0_13] : memref<8x192xf32, #tpu.memory_space<vmem>>, vector<1x16xf32>
    %cst_14 = arith.constant 9.99999974E-6 : f32
    %25 = vector.broadcast %cst_14 : f32 to vector<1x16xf32>
    %26 = arith.addf %23, %25 : vector<1x16xf32>
    %27 = math.rsqrt %26 : vector<1x16xf32>
    %28 = arith.mulf %24, %27 : vector<1x16xf32>
    %c2 = arith.constant 2 : index
    %c0_15 = arith.constant 0 : index
    %29 = vector.load %arg2[%c2, %c0_15] : memref<8x192xf32, #tpu.memory_space<vmem>>, vector<1x16xf32>
    %30 = arith.mulf %18, %28 : vector<1x16xf32>
    %31 = arith.subf %29, %30 : vector<1x16xf32>
    %32 = tpu.concatenate %28, %31 in 0 : vector<1x16xf32>, vector<1x16xf32> -> vector<2x16xf32>
    %c160 = arith.constant 160 : index
    %c0_16 = arith.constant 0 : index
    %33 = vector.load %arg1[%c160, %c0_16] : memref<504x192xf32, #tpu.memory_space<vmem>>, vector<16x64xf32>
    %cst_17 = arith.constant dense<0.000000e+00> : vector<2x64xf32>
    %34 = tpu.matmul %32, %33, %cst_17 {dimension_numbers = #tpu.dot_dimension_numbers<[1], [0], [0], [1], [0, 0, 1, 1], [], []>, precision = #tpu.contract_precision<fp32>} : vector<2x16xf32>, vector<16x64xf32>, vector<2x64xf32> -> vector<2x64xf32>
    %35 = vector.extract_strided_slice %34 {offsets = [0, 0], sizes = [1, 64], strides = [1, 1]} : vector<2x64xf32> to vector<1x64xf32>
    %36 = vector.broadcast %35 : vector<1x64xf32> to vector<2x64xf32>
    %37 = arith.mulf %7, %36 : vector<2x64xf32>
    %38 = vector.extract_strided_slice %34 {offsets = [1, 0], sizes = [1, 64], strides = [1, 1]} : vector<2x64xf32> to vector<1x64xf32>
    %39 = vector.broadcast %38 : vector<1x64xf32> to vector<2x64xf32>
    %40 = arith.addf %37, %39 : vector<2x64xf32>
    %cst_18 = arith.constant 0.000000e+00 : f32
    %41 = vector.broadcast %cst_18 : f32 to vector<2x64xf32>
    %42 = arith.cmpf oge, %40, %41 : vector<2x64xf32>
    %cst_19 = arith.constant 0.00999999977 : f32
    %43 = vector.broadcast %cst_19 : f32 to vector<2x64xf32>
    %44 = arith.mulf %43, %40 : vector<2x64xf32>
    %45 = arith.select %42, %40, %44 : vector<2x64xi1>, vector<2x64xf32>
    %c176 = arith.constant 176 : index
    %c0_20 = arith.constant 0 : index
    %46 = vector.load %arg1[%c176, %c0_20] : memref<504x192xf32, #tpu.memory_space<vmem>>, vector<64x128xf32>
    %cst_21 = arith.constant dense<0.000000e+00> : vector<2x128xf32>
    %47 = tpu.matmul %45, %46, %cst_21 {dimension_numbers = #tpu.dot_dimension_numbers<[1], [0], [0], [1], [0, 0, 1, 1], [], []>} : vector<2x64xf32>, vector<64x128xf32>, vector<2x128xf32> -> vector<2x128xf32>
    %cst_22 = arith.constant dense<0.000000e+00> : vector<128xf32>
    %48 = vector.multi_reduction <add>, %47, %cst_22 [0] : vector<2x128xf32> to vector<128xf32>
    %49 = vector.shape_cast %48 : vector<128xf32> to vector<1x128xf32>
    %50 = arith.mulf %47, %47 : vector<2x128xf32>
    %cst_23 = arith.constant dense<0.000000e+00> : vector<128xf32>
    %51 = vector.multi_reduction <add>, %50, %cst_23 [0] : vector<2x128xf32> to vector<128xf32>
    %52 = vector.shape_cast %51 : vector<128xf32> to vector<1x128xf32>
    %53 = tpu.concatenate %49, %52 in 0 : vector<1x128xf32>, vector<1x128xf32> -> vector<2x128xf32>
    %c240 = arith.constant 240 : index
    %c0_24 = arith.constant 0 : index
    %54 = vector.load %arg1[%c240, %c0_24] : memref<504x192xf32, #tpu.memory_space<vmem>>, vector<128x8xf32>
    %cst_25 = arith.constant dense<0.000000e+00> : vector<2x8xf32>
    %55 = tpu.matmul %53, %54, %cst_25 {dimension_numbers = #tpu.dot_dimension_numbers<[1], [0], [0], [1], [0, 0, 1, 1], [], []>, precision = #tpu.contract_precision<fp32>} : vector<2x128xf32>, vector<128x8xf32>, vector<2x8xf32> -> vector<2x8xf32>
    %56 = vector.extract_strided_slice %55 {offsets = [0, 0], sizes = [1, 8], strides = [1, 1]} : vector<2x8xf32> to vector<1x8xf32>
    %cst_26 = arith.constant 3.125000e-02 : f32
    %57 = vector.broadcast %cst_26 : f32 to vector<1x8xf32>
    %58 = arith.mulf %56, %57 : vector<1x8xf32>
    %59 = vector.extract_strided_slice %55 {offsets = [1, 0], sizes = [1, 8], strides = [1, 1]} : vector<2x8xf32> to vector<1x8xf32>
    %cst_27 = arith.constant 3.125000e-02 : f32
    %60 = vector.broadcast %cst_27 : f32 to vector<1x8xf32>
    %61 = arith.mulf %59, %60 : vector<1x8xf32>
    %62 = arith.mulf %58, %58 : vector<1x8xf32>
    %63 = arith.subf %61, %62 : vector<1x8xf32>
    %c3 = arith.constant 3 : index
    %c0_28 = arith.constant 0 : index
    %64 = vector.load %arg2[%c3, %c0_28] : memref<8x192xf32, #tpu.memory_space<vmem>>, vector<1x8xf32>
    %cst_29 = arith.constant 9.99999974E-6 : f32
    %65 = vector.broadcast %cst_29 : f32 to vector<1x8xf32>
    %66 = arith.addf %63, %65 : vector<1x8xf32>
    %67 = math.rsqrt %66 : vector<1x8xf32>
    %68 = arith.mulf %64, %67 : vector<1x8xf32>
    %c4 = arith.constant 4 : index
    %c0_30 = arith.constant 0 : index
    %69 = vector.load %arg2[%c4, %c0_30] : memref<8x192xf32, #tpu.memory_space<vmem>>, vector<1x8xf32>
    %70 = arith.mulf %58, %68 : vector<1x8xf32>
    %71 = arith.subf %69, %70 : vector<1x8xf32>
    %72 = tpu.concatenate %68, %71 in 0 : vector<1x8xf32>, vector<1x8xf32> -> vector<2x8xf32>
    %c368 = arith.constant 368 : index
    %c0_31 = arith.constant 0 : index
    %73 = vector.load %arg1[%c368, %c0_31] : memref<504x192xf32, #tpu.memory_space<vmem>>, vector<8x128xf32>
    %cst_32 = arith.constant dense<0.000000e+00> : vector<2x128xf32>
    %74 = tpu.matmul %72, %73, %cst_32 {dimension_numbers = #tpu.dot_dimension_numbers<[1], [0], [0], [1], [0, 0, 1, 1], [], []>, precision = #tpu.contract_precision<fp32>} : vector<2x8xf32>, vector<8x128xf32>, vector<2x128xf32> -> vector<2x128xf32>
    %75 = vector.extract_strided_slice %74 {offsets = [0, 0], sizes = [1, 128], strides = [1, 1]} : vector<2x128xf32> to vector<1x128xf32>
    %76 = vector.broadcast %75 : vector<1x128xf32> to vector<2x128xf32>
    %77 = arith.mulf %47, %76 : vector<2x128xf32>
    %78 = vector.extract_strided_slice %74 {offsets = [1, 0], sizes = [1, 128], strides = [1, 1]} : vector<2x128xf32> to vector<1x128xf32>
    %79 = vector.broadcast %78 : vector<1x128xf32> to vector<2x128xf32>
    %80 = arith.addf %77, %79 : vector<2x128xf32>
    %cst_33 = arith.constant 0.000000e+00 : f32
    %81 = vector.broadcast %cst_33 : f32 to vector<2x128xf32>
    %82 = arith.cmpf oge, %80, %81 : vector<2x128xf32>
    %cst_34 = arith.constant 0.00999999977 : f32
    %83 = vector.broadcast %cst_34 : f32 to vector<2x128xf32>
    %84 = arith.mulf %83, %80 : vector<2x128xf32>
    %85 = arith.select %82, %80, %84 : vector<2x128xi1>, vector<2x128xf32>
    %c376 = arith.constant 376 : index
    %c0_35 = arith.constant 0 : index
    %86 = vector.load %arg1[%c376, %c0_35] : memref<504x192xf32, #tpu.memory_space<vmem>>, vector<128x192xf32>
    %cst_36 = arith.constant dense<0.000000e+00> : vector<2x192xf32>
    %87 = tpu.matmul %85, %86, %cst_36 {dimension_numbers = #tpu.dot_dimension_numbers<[1], [0], [0], [1], [0, 0, 1, 1], [], []>} : vector<2x128xf32>, vector<128x192xf32>, vector<2x192xf32> -> vector<2x192xf32>
    %c5 = arith.constant 5 : index
    %c0_37 = arith.constant 0 : index
    %88 = vector.load %arg2[%c5, %c0_37] : memref<8x192xf32, #tpu.memory_space<vmem>>, vector<1x192xf32>
    %89 = vector.broadcast %88 : vector<1x192xf32> to vector<2x192xf32>
    %90 = arith.addf %87, %89 : vector<2x192xf32>
    %cst_38 = arith.constant 0.000000e+00 : f32
    %91 = vector.broadcast %cst_38 : f32 to vector<2x192xf32>
    %92 = arith.subf %91, %90 : vector<2x192xf32>
    %93 = math.exp %92 : vector<2x192xf32>
    %cst_39 = arith.constant 1.000000e+00 : f32
    %94 = vector.broadcast %cst_39 : f32 to vector<2x192xf32>
    %95 = arith.addf %94, %93 : vector<2x192xf32>
    %96 = tpu.reciprocal %95 {approx = true} : vector<2x192xf32> -> vector<2x192xf32>
    %c0_40 = arith.constant 0 : index
    %c0_41 = arith.constant 0 : index
    %97 = vector.load %arg3[%c0_40, %c0_41] : memref<2x192xf32, #tpu.memory_space<vmem>>, vector<2x192xf32>
    tpu.vector_store %arg3[%c0_40, %c0_41], %96 {strides = array<i32>} : memref<2x192xf32, #tpu.memory_space<vmem>>, vector<2x192xf32>,
    return
  }
}

</mosaic_0001>

<bundles_post_ra>
// kernel: decoder_forward.1
= control target key start
LH: loop header
LB: loop body
LE: loop exit
PB: predicated region body
PF: predicated region fallthrough
CT: control target
= control target key end

     0   :  { %vm20_vm0 = vcmask 261120   ;;  %vm52_vm1 = vcmask 523264   ;;  %vm76_vm2 = vcmask 517120   ;;  %vm92_vm3 = vcmask 1040384   ;;  %s1823_s1 = inlined_call_operand.vmem [shape: f32[504,192], index: 1, kind: input, shape index: {}]   ;;  %s1824_s0 = inlined_call_operand.vmem [shape: f32[2,32], index: 0, kind: input, shape index: {}]   ;;  %s1825_s2 = inlined_call_operand.vmem [shape: f32[8,192], index: 2, kind: input, shape index: {}]   ;;  %s1826_s3 = inlined_call_operand.vmem [shape: f32[2,192], index: 3, kind: output, shape index: {}]  }
   0x1   :  { %v18_v0 = vld [vmem:[%s1823_s1 + $0x30] sm:$0xff]  ;;  %v17_v1 = vld [vmem:[%s1823_s1 + $0x20] sm:$0xff]  ;;  %vm373_vm7 = vcmask 130048   ;;  %vm574_vm9 = vcmask 1041408   ;;  %vm978_vm13 = vcmask 64512   ;;  %vm1229_vm15 = vcmask 519170  }
   0x2   :  { %36 = vmatpush.msra.mxu0 %v18_v0  ;;  %v51_v2 = vld [vmem:[%s1823_s1 + $0xb0] sm:$0xff]  ;;  %v50_v4 = vld [vmem:[%s1823_s1 + $0xa0] sm:$0xff] }
   0x3   :  { %v16_v3 = vld [vmem:[%s1823_s1 + $0x10] sm:$0xff]  ;;  %64 = vmatpush.msra.mxu3 %v51_v2  ;;  %v15_v6 = vld [vmem:[%s1823_s1] sm:$0xff] }
   0x4   :  { %37 = vmatpush.msra.mxu0 %v17_v1  ;;  %v49_v5 = vld [vmem:[%s1823_s1 + $0x90] sm:$0xff]  ;;  %v14_v7 = vld [vmem:[%s1824_s0] sm:$0x3] }
   0x5   :  { %65 = vmatpush.msra.mxu3 %v50_v4  ;;  %v48_v8 = vld [vmem:[%s1823_s1 + $0x80] sm:$0xff]  ;;  %v47_v9 = vld [vmem:[%s1823_s1 + $0x70] sm:$0xff] }
   0x6   :  { %38 = vmatpush.msra.mxu0 %v16_v3  ;;  %v46_v10 = vld [vmem:[%s1823_s1 + $0x60] sm:$0xff]  ;;  %v45_v11 = vld [vmem:[%s1823_s1 + $0x50] sm:$0xff] }
   0x7   :  { %66 = vmatpush.msra.mxu3 %v49_v5  ;;  %v44_v12 = vld [vmem:[%s1823_s1 + $0x40] sm:$0xff]  ;;  %v101_v13 = vld [vmem:[%s1823_s1 + $0x130] sm:$0xff] }
   0x8   :  { %39 = vmatpush.msra.mxu0 %v15_v6  ;;  %v1314_v14 = vand.u32 4294901760, %v101_v13  ;;  %v19_v19 = vld [vmem:[%s1825_s2] ss:$0 sm:$0xff]  ;;  %v99_v24 = vld [vmem:[%s1823_s1 + $0x110] sm:$0xff] }
   0x9   :  { %1236 = vmatmul.msk.f32.vlgmr.msra.gmra.mxu0 %vm20_vm0, %v14_v7  ;;  %67 = vmatpush.msra.mxu3 %v48_v8  ;;  %v100_v22 = vld [vmem:[%s1823_s1 + $0x120] sm:$0xff]  ;;  %v1336_v26 = vand.u32 4294901760, %v99_v24  ;;  %v97_v31 = vld [vmem:[%s1823_s1 + $0xf0] sm:$0xff]  ;;  %vm1230_vm0 = vmor %vm1229_vm15, %vm574_vm9 }
   0xa   :  { %v1317_v15 = vsub.f32 %v101_v13, %v1314_v14  ;;  %114 = vmatpush.msrb.mxu0 %v1314_v14  ;;  %246 = vmatpush.msra.mxu1 %v1314_v14  ;;  %v1330_v23 = vand.u32 4294901760, %v100_v22  ;;  %v98_v27 = vld [vmem:[%s1823_s1 + $0x100] sm:$0xff]  ;;  %v1352_v35 = vand.u32 4294901760, %v97_v31  ;;  %v95_v42 = vld [vmem:[%s1823_s1 + $0xd0] sm:$0xff] }
   0xb   :  { %68 = vmatpush.msra.mxu3 %v47_v9  ;;  %v159_v29 = vsub.f32 %v99_v24, %v1336_v26  ;;  %v1344_v30 = vand.u32 4294901760, %v98_v27  ;;  %v96_v36 = vld [vmem:[%s1823_s1 + $0xe0] sm:$0xff]  ;;  %v125_v47 = vand.u32 4294901760, %v95_v42 }
   0xc   :  { %v148_v16 = vand.u32 4294901760, %v1317_v15  ;;  %v153_v25 = vsub.f32 %v100_v22, %v1330_v23  ;;  %116 = vmatpush.msrb.mxu0 %v1330_v23  ;;  %248 = vmatpush.msra.mxu1 %v1330_v23  ;;  %v171_v40 = vsub.f32 %v97_v31, %v1352_v35  ;;  %v123_v41 = vand.u32 4294901760, %v96_v36  ;;  %v94_v48 = vld [vmem:[%s1823_s1 + $0xc0] sm:$0xff] }
   0xd   :  { %69 = vmatpush.msra.mxu3 %v46_v10  ;;  %v160_v33 = vand.u32 4294901760, %v159_v29  ;;  %v165_v34 = vsub.f32 %v98_v27, %v1344_v30  ;;  %v127_v51 = vand.u32 4294901760, %v94_v48  ;;  %v183_v53 = vsub.f32 %v95_v42, %v125_v47 }
   0xe   :  { %v149_v17 = vsub.f32 %v1317_v15, %v148_v16  ;;  %279 = vmatpush.msra.mxu2 %v148_v16  ;;  %v154_v28 = vand.u32 4294901760, %v153_v25  ;;  %118 = vmatpush.msrb.mxu0 %v1336_v26  ;;  %v172_v45 = vand.u32 4294901760, %v171_v40  ;;  %v177_v46 = vsub.f32 %v96_v36, %v123_v41 }
   0xf   :  { %70 = vmatpush.msra.mxu3 %v45_v11  ;;  %250 = vmatpush.msra.mxu1 %v1336_v26  ;;  %v161_v38 = vsub.f32 %v159_v29, %v160_v33  ;;  %v166_v39 = vand.u32 4294901760, %v165_v34  ;;  %v189_v55 = vsub.f32 %v94_v48, %v127_v51  ;;  %v184_v57 = vand.u32 4294901760, %v183_v53 }
  0x10   :  { %v150_v18 = vand.u32 4294901760, %v149_v17  ;;  %v155_v32 = vsub.f32 %v153_v25, %v154_v28  ;;  %283 = vmatpush.msra.mxu2 %v154_v28  ;;  %120 = vmatpush.msrb.mxu0 %v1344_v30  ;;  %v173_v50 = vsub.f32 %v171_v40, %v172_v45  ;;  %v178_v52 = vand.u32 4294901760, %v177_v46 }
  0x11   :  { %71 = vmatpush.msra.mxu3 %v44_v12  ;;  %252 = vmatpush.msra.mxu1 %v1344_v30  ;;  %v162_v43 = vand.u32 4294901760, %v161_v38  ;;  %v167_v44 = vsub.f32 %v165_v34, %v166_v39  ;;  %v190_v58 = vand.u32 4294901760, %v189_v55  ;;  %v185_v60 = vsub.f32 %v183_v53, %v184_v57  ;;  %v371_v38 = vld [vmem:[%s1823_s1 + $0x140] sm:$0xff] }
  0x12   :  { %v156_v37 = vand.u32 4294901760, %v155_v32  ;;  %287 = vmatpush.msra.mxu2 %v160_v33  ;;  %122 = vmatpush.msrb.mxu0 %v1352_v35  ;;  %v174_v54 = vand.u32 4294901760, %v173_v50  ;;  %v179_v56 = vsub.f32 %v177_v46, %v178_v52 }
  0x13   :  { %151 = vmatpush.msrb.mxu3 %v150_v18  ;;  %254 = vmatpush.msra.mxu1 %v1352_v35  ;;  %v168_v49 = vand.u32 4294901760, %v167_v44  ;;  %v191_v61 = vsub.f32 %v189_v55, %v190_v58  ;;  %v186_v62 = vand.u32 4294901760, %v185_v60 }
  0x14   :  { %291 = vmatpush.msra.mxu2 %v166_v39  ;;  %124 = vmatpush.msrb.mxu0 %v123_v41  ;;  %v180_v59 = vand.u32 4294901760, %v179_v56  ;;  %v348_v56 = vld [vmem:[%s1825_s2 + $0x1] ss:$0 sm:$0xff] }
  0x15   :  { %157 = vmatpush.msrb.mxu3 %v156_v37  ;;  %256 = vmatpush.msra.mxu1 %v123_v41  ;;  %v192_v63 = vand.u32 4294901760, %v191_v61  ;;  %v361_v61 = vld [vmem:[%s1825_s2 + $0x2] ss:$0 sm:$0xff] }
  0x16   :  { %295 = vmatpush.msra.mxu2 %v172_v45  ;;  %126 = vmatpush.msrb.mxu0 %v125_v47 }
  0x17   :  { %163 = vmatpush.msrb.mxu3 %v162_v43  ;;  %258 = vmatpush.msra.mxu1 %v125_v47 }
  0x18   :  { %299 = vmatpush.msra.mxu2 %v178_v52  ;;  %128 = vmatpush.msrb.mxu0 %v127_v51 }
  0x19   :  { %169 = vmatpush.msrb.mxu3 %v168_v49  ;;  %260 = vmatpush.msra.mxu1 %v127_v51 }
  0x1a   :  { %209 = vmatpush.msra.mxu0 %v1317_v15  ;;  %303 = vmatpush.msra.mxu2 %v184_v57 }
  0x1b   :  { %175 = vmatpush.msrb.mxu3 %v174_v54 }
  0x1c   :  { %212 = vmatpush.msra.mxu0 %v153_v25  ;;  %307 = vmatpush.msra.mxu2 %v190_v58 }
  0x1d   :  { %181 = vmatpush.msrb.mxu3 %v180_v59 }
  0x1e   :  { %215 = vmatpush.msra.mxu0 %v159_v29 }
  0x1f   :  { %187 = vmatpush.msrb.mxu3 %v186_v62 }
  0x20   :  { %218 = vmatpush.msra.mxu0 %v165_v34 }
  0x21   :  { %193 = vmatpush.msrb.mxu3 %v192_v63 }
  0x22   :  { %221 = vmatpush.msra.mxu0 %v171_v40  ;;  %v393_v40 = vand.u32 4294901760, %v371_v38 }
  0x24   :  { %224 = vmatpush.msra.mxu0 %v177_v46  ;;  %v425_v43 = vsub.f32 %v371_v38, %v393_v40 }
  0x26   :  { %227 = vmatpush.msra.mxu0 %v183_v53  ;;  %v426_v45 = vand.u32 4294901760, %v425_v43 }
  0x28   :  { %230 = vmatpush.msra.mxu0 %v189_v55  ;;  %v427_v50 = vsub.f32 %v425_v43, %v426_v45 }
  0x2a   :  { %v428_v53 = vand.u32 4294901760, %v427_v50 }
  0x86   :  { %v41_v20 = vpop.f32.mrf.mxu0 }
  0x87   :  { %v42_v21 = vadd.f32 %v41_v20, %v19_v19 }
  0x89   :  { %1237 = vmatmul.msk.f32.vlgmr.msra.gmra.mxu3 %vm52_vm1, %v42_v21 }
  0x8a   :  { %322 = vmatpush.msra.mxu3 %v1314_v14 }
  0x8c   :  { %324 = vmatpush.msra.mxu3 %v1330_v23 }
  0x8e   :  { %326 = vmatpush.msra.mxu3 %v1336_v26 }
  0x90   :  { %328 = vmatpush.msra.mxu3 %v1344_v30 }
  0x92   :  { %330 = vmatpush.msra.mxu3 %v1352_v35  ;;  %v372_v35 = vld [vmem:[%s1823_s1 + $0x150] sm:$0xff] }
  0x93   :  { %v391_v36 = vand.u32 4294901760, %v372_v35 }
  0x94   :  { %332 = vmatpush.msra.mxu3 %v123_v41 }
  0x95   :  { %v419_v39 = vsub.f32 %v372_v35, %v391_v36  ;;  %476 = vmatpush.msrb.mxu2 %v391_v36 }
  0x96   :  { %334 = vmatpush.msra.mxu3 %v125_v47 }
  0x97   :  { %v420_v42 = vand.u32 4294901760, %v419_v39  ;;  %451 = vmatpush.msrb.mxu1 %v419_v39  ;;  %478 = vmatpush.msrb.mxu2 %v393_v40 }
  0x98   :  { %336 = vmatpush.msra.mxu3 %v127_v51 }
  0x99   :  { %454 = vmatpush.msrb.mxu1 %v425_v43  ;;  %v421_v49 = vsub.f32 %v419_v39, %v420_v42 }
  0x9b   :  { %v422_v52 = vand.u32 4294901760, %v421_v49 }
 0x10c   :  { %v1374_v0 = vpop.f32.mrf.mxu3 }
 0x10d   :  { %v77_v1 = vsel %vm76_vm2, %v1374_v0, 0.0  ;;  %v84_v2 = vmul.f32 %v1374_v0, %v1374_v0 }
 0x10e   :  { %v78_v3 = vrot.slane %v77_v1, 4 }
 0x10f   :  { %v85_v4 = vsel %vm76_vm2, %v84_v2, 0.0 }
 0x110   :  { %v79_v5 = vadd.f32 %v78_v3, %v77_v1  ;;  %v86_v6 = vrot.slane %v85_v4, 4 }
 0x112   :  { %v80_v7 = vrot.slane %v79_v5, 2  ;;  %v87_v8 = vadd.f32 %v86_v6, %v85_v4 }
 0x114   :  { %v81_v9 = vadd.f32 %v80_v7, %v79_v5  ;;  %v88_v10 = vrot.slane %v87_v8, 2 }
 0x116   :  { %v82_v11 = vrot.slane %v81_v9, 1  ;;  %v89_v12 = vadd.f32 %v88_v10, %v87_v8  ;;  %v549_v10 = vld [vmem:[%s1823_s1 + $0x1c0] sm:$0xff] }
 0x118   :  { %v90_v13 = vrot.slane %v89_v12, 1  ;;  %v83_v14 = vadd.f32 %v82_v11, %v81_v9  ;;  %v550_v9 = vld [vmem:[%s1823_s1 + $0x1d0] sm:$0xff] }
 0x119   :  { %v548_v11 = vld [vmem:[%s1823_s1 + $0x1b0] sm:$0xff] }
 0x11a   :  { %v91_v15 = vadd.f32 %v90_v13, %v89_v12  ;;  %v547_v12 = vld [vmem:[%s1823_s1 + $0x1a0] sm:$0xff]  ;;  %v546_v13 = vld [vmem:[%s1823_s1 + $0x190] sm:$0xff] }
 0x11c   :  { %v93_v16 = vsel %vm92_vm3, %v83_v14, %v91_v15  ;;  %v545_v14 = vld [vmem:[%s1823_s1 + $0x180] sm:$0xff]  ;;  %v544_v15 = vld [vmem:[%s1823_s1 + $0x170] sm:$0xff] }
 0x11d   :  { %v103_v17 = vsel %vm52_vm1, %v93_v16, 0  ;;  %v543_v16 = vld [vmem:[%s1823_s1 + $0x160] sm:$0xff] }
 0x11e   :  { %v129_v18 = vand.u32 4294901760, %v103_v17 }
 0x120   :  { %195 = vmatmul.f32.vlgmr.msrb.gmra.mxu3 %v129_v18  ;;  %309 = vmatmul.f32.vlgmr.msra.gmra.mxu2 %v129_v18  ;;  %v130_v19 = vsub.f32 %v103_v17, %v129_v18  ;;  %v606_v17 = vld [vmem:[%s1823_s1 + $0x2d0] sm:$0xff] }
 0x121   :  { %503 = vmatpush.msrb.mxu3 %v420_v42 }
 0x122   :  { %v131_v20 = vand.u32 4294901760, %v130_v19 }
 0x123   :  { %507 = vmatpush.msrb.mxu3 %v426_v45 }
 0x124   :  { %v132_v21 = vsub.f32 %v130_v19, %v131_v20  ;;  %264 = vmatmul.f32.vlgmr.msra.gmra.mxu1 %v131_v20  ;;  %v1427_v20 = vand.u32 4294901760, %v606_v17 }
 0x125   :  { %562 = vmatpush.msra.mxu1 %v550_v9 }
 0x126   :  { %v133_v22 = vand.u32 4294901760, %v132_v21  ;;  %608 = vmatpush.msra.mxu2 %v1427_v20 }
 0x127   :  { %563 = vmatpush.msra.mxu1 %v549_v10  ;;  %v593_v10 = vld [vmem:[%s1823_s1 + $0x200] sm:$0xff] }
 0x128   :  { %134 = vmatmul.f32.vlgmr.msrb.gmra.mxu0 %v133_v22  ;;  %338 = vmatmul.f32.vlgmr.msra.gmra.mxu3 %v129_v18  ;;  %v605_v18 = vld [vmem:[%s1823_s1 + $0x2c0] sm:$0xff] }
 0x129   :  { %392 = vmatpush.msrb.mxu0 %v391_v36  ;;  %564 = vmatpush.msra.mxu1 %v548_v11  ;;  %v1429_v21 = vand.u32 4294901760, %v605_v18 }
 0x12b   :  { %394 = vmatpush.msrb.mxu0 %v393_v40  ;;  %565 = vmatpush.msra.mxu1 %v547_v12 }
 0x12c   :  { %610 = vmatpush.msra.mxu2 %v1429_v21 }
 0x12d   :  { %566 = vmatpush.msra.mxu1 %v546_v13 }
 0x12f   :  { %567 = vmatpush.msra.mxu1 %v545_v14 }
 0x130   :  { %233 = vmatmul.f32.vlgmr.msra.gmra.mxu0 %v130_v19  ;;  %v604_v19 = vld [vmem:[%s1823_s1 + $0x2b0] sm:$0xff] }
 0x131   :  { %423 = vmatpush.msra.mxu0 %v422_v52  ;;  %568 = vmatpush.msra.mxu1 %v544_v15  ;;  %v1431_v22 = vand.u32 4294901760, %v604_v19  ;;  %v597_v52 = vld [vmem:[%s1823_s1 + $0x240] sm:$0xff] }
 0x133   :  { %429 = vmatpush.msra.mxu0 %v428_v53  ;;  %569 = vmatpush.msra.mxu1 %v543_v16  ;;  %v596_v53 = vld [vmem:[%s1823_s1 + $0x230] sm:$0xff] }
 0x134   :  { %612 = vmatpush.msra.mxu2 %v1431_v22 }
 0x1a1   :  { %v265_v28 = vpop.f32.mrf.mxu1 }
 0x1a3   :  { %v196_v24 = vpop.f32.mrf.mxu3  ;;  %v310_v30 = vpop.f32.mrf.mxu2 }
 0x1a5   :  { %v135_v23 = vpop.f32.mrf.mxu0 }
 0x1a6   :  { %v197_v25 = vadd.f32 %v196_v24, %v135_v23  ;;  %v603_v23 = vld [vmem:[%s1823_s1 + $0x2a0] sm:$0xff]  ;;  %v602_v24 = vld [vmem:[%s1823_s1 + $0x290] sm:$0xff] }
 0x1ab   :  { %v339_v32 = vpop.f32.mrf.mxu3 }
 0x1ad   :  { %v234_v26 = vpop.f32.mrf.mxu0 }
 0x1ae   :  { %v235_v27 = vadd.f32 %v234_v26, %v197_v25  ;;  %v601_v25 = vld [vmem:[%s1823_s1 + $0x280] sm:$0xff]  ;;  %v1442_v26 = vand.u32 4294901760, %v603_v23 }
 0x1b0   :  { %v266_v29 = vadd.f32 %v265_v28, %v235_v27  ;;  %v1444_v27 = vand.u32 4294901760, %v602_v24  ;;  %v1446_v28 = vand.u32 4294901760, %v601_v25  ;;  %614 = vmatpush.msra.mxu2 %v1442_v26 }
 0x1b2   :  { %v311_v31 = vadd.f32 %v310_v30, %v266_v29  ;;  %v600_v29 = vld [vmem:[%s1823_s1 + $0x270] sm:$0xff]  ;;  %v599_v30 = vld [vmem:[%s1823_s1 + $0x260] sm:$0xff]  ;;  %v1474_v38 = vsub.f32 %v601_v25, %v1446_v28  ;;  %616 = vmatpush.msra.mxu2 %v1444_v27 }
 0x1b3   :  { %v1476_v39 = vand.u32 4294901760, %v599_v30 }
 0x1b4   :  { %v340_v33 = vadd.f32 %v339_v32, %v311_v31  ;;  %v1455_v31 = vsub.f32 %v606_v17, %v1427_v20  ;;  %v1458_v32 = vsub.f32 %v605_v18, %v1429_v21  ;;  %v680_v49 = vand.u32 4294901760, %v1474_v38  ;;  %618 = vmatpush.msra.mxu2 %v1446_v28  ;;  %v592_v18 = vld [vmem:[%s1823_s1 + $0x1f0] sm:$0xff] }
 0x1b5   :  { %v1502_v50 = vsub.f32 %v599_v30, %v1476_v39 }
 0x1b6   :  { %v342_v34 = vmul.f32 0.125, %v340_v33  ;;  %v1461_v33 = vsub.f32 %v604_v19, %v1431_v22 }
 0x1b8   :  { %v343_v37 = vmul.f32 %v342_v34, %v342_v34  ;;  %v662_v42 = vand.u32 4294901760, %v1461_v33 }
 0x1ba   :  { %v345_v41 = vrot.slane %v343_v37, 7  ;;  %v1471_v37 = vsub.f32 %v602_v24, %v1444_v27  ;;  %v1572_v24 = vand.u32 4294901760, %v593_v10 }
 0x1bc   :  { %v347_v44 = vsub.f32 %v342_v34, %v345_v41  ;;  %v656_v41 = vand.u32 4294901760, %v1458_v32 }
 0x1be   :  { %v349_v46 = vadd.f32 1e-05, %v347_v44  ;;  %v674_v44 = vand.u32 4294901760, %v1471_v37 }
 0x1c0   :  { %1240 = vrsqrt.f32 %v349_v46  ;;  %vm356_vm5 = vweird.f32 %v349_v46 }
 0x1c6   :  { %v1241_v47 = vpop.eup %1240 }
 0x1c7   :  { %v351_v48 = vmul.f32 %v1241_v47, %v349_v46  ;;  %vm357_vm4 = vweird.f32 %v1241_v47 }
 0x1c8   :  { %vm358_vm6 = vmor %vm356_vm5, %vm357_vm4 }
 0x1c9   :  { %v352_v51 = vmul.f32 %v1241_v47, %v351_v48  ;;  %v663_v48 = vsub.f32 %v1461_v33, %v662_v42 }
 0x1cb   :  { %v353_v54 = vmul.f32 0.5, %v352_v51  ;;  %v598_v51 = vld [vmem:[%s1823_s1 + $0x250] sm:$0xff] }
 0x1cd   :  { %v354_v55 = vsub.f32 1.5, %v353_v54 }
 0x1cf   :  { %v355_v57 = vmul.f32 %v1241_v47, %v354_v55 }
 0x1d1   :  { %v359_v58 = vsel %vm358_vm6, %v1241_v47, %v355_v57  ;;  %v657_v47 = vsub.f32 %v1458_v32, %v656_v41  ;;  %v595_v57 = vld [vmem:[%s1823_s1 + $0x220] sm:$0xff] }
 0x1d2   :  { %v360_v59 = vmul.f32 %v359_v58, %v348_v56  ;;  %v675_v58 = vsub.f32 %v1471_v37, %v674_v44 }
 0x1d3   :  { %v658_v55 = vand.u32 4294901760, %v657_v47 }
 0x1d4   :  { %v363_v60 = vrot.slane %v360_v59, 1  ;;  %v676_v12 = vand.u32 4294901760, %v675_v58  ;;  %v1597_v58 = vsub.f32 %v593_v10, %v1572_v24 }
 0x1d6   :  { %v365_v62 = vmul.f32 %v363_v60, %v342_v34  ;;  %v1464_v34 = vand.u32 4294901760, %v600_v29 }
 0x1d8   :  { %v366_v63 = vsub.f32 %v361_v61, %v365_v62  ;;  %v1486_v45 = vsub.f32 %v600_v29, %v1464_v34  ;;  %v1528_v61 = vand.u32 4294901760, %v598_v51  ;;  %v1530_v62 = vand.u32 4294901760, %v597_v52  ;;  %620 = vmatpush.msra.mxu2 %v1464_v34 }
 0x1da   :  { %v368_v1 = vrot.slane %v366_v63, 7  ;;  %v686_v59 = vand.u32 4294901760, %v1486_v45  ;;  %v1532_v63 = vand.u32 4294901760, %v596_v53  ;;  %v1550_v9 = vsub.f32 %v597_v52, %v1530_v62  ;;  %622 = vmatpush.msra.mxu2 %v1476_v39 }
 0x1dc   :  { %v370_v2 = vsel %vm92_vm3, %v363_v60, %v368_v1  ;;  %v664_v60 = vand.u32 4294901760, %v663_v48  ;;  %v687_v13 = vsub.f32 %v1486_v45, %v686_v59  ;;  %v1562_v16 = vsub.f32 %v596_v53, %v1532_v63  ;;  %624 = vmatpush.msra.mxu2 %v1528_v61 }
 0x1dd   :  { %v375_v3 = vsel %vm373_vm7, %v370_v2, 0  ;;  %v681_v2 = vsub.f32 %v1474_v38, %v680_v49  ;;  %v1581_v48 = vand.u32 4294901760, %v592_v18 }
 0x1de   :  { %v395_v4 = vand.u32 4294901760, %v375_v3  ;;  %v688_v47 = vand.u32 4294901760, %v687_v13  ;;  %626 = vmatpush.msra.mxu2 %v1530_v62 }
 0x1df   :  { %v682_v29 = vand.u32 4294901760, %v681_v2 }
 0x1e0   :  { %509 = vmatmul.f32.vlgmr.msrb.gmra.mxu3 %v395_v4  ;;  %v396_v5 = vsub.f32 %v375_v3, %v395_v4  ;;  %v692_v3 = vand.u32 4294901760, %v1502_v50  ;;  %628 = vmatpush.msra.mxu2 %v1532_v63 }
 0x1e2   :  { %457 = vmatmul.f32.vlgmr.msrb.gmra.mxu1 %v396_v5  ;;  %v397_v6 = vand.u32 4294901760, %v396_v5  ;;  %v693_v30 = vsub.f32 %v1502_v50, %v692_v3 }
 0x1e3   :  { %804 = vmatpush.msrb.mxu1 %v1427_v20 }
 0x1e4   :  { %v398_v7 = vsub.f32 %v396_v5, %v397_v6  ;;  %482 = vmatmul.f32.vlgmr.msrb.gmra.mxu2 %v397_v6  ;;  %v594_v5 = vld [vmem:[%s1823_s1 + $0x210] sm:$0xff] }
 0x1e5   :  { %806 = vmatpush.msrb.mxu1 %v1429_v21  ;;  %v1564_v17 = vand.u32 4294901760, %v594_v5 }
 0x1e6   :  { %v399_v8 = vand.u32 4294901760, %v398_v7 }
 0x1e7   :  { %808 = vmatpush.msrb.mxu1 %v1431_v22 }
 0x1e8   :  { %400 = vmatmul.f32.vlgmr.msrb.gmra.mxu0 %v399_v8  ;;  %v1546_v8 = vsub.f32 %v598_v51, %v1528_v61  ;;  %v591_v51 = vld [vmem:[%s1823_s1 + $0x1e0] sm:$0xff] }
 0x1e9   :  { %528 = vmatpush.msrb.mxu0 %v391_v36  ;;  %v1468_v36 = vsub.f32 %v603_v23, %v1442_v26  ;;  %810 = vmatpush.msrb.mxu1 %v1442_v26 }
 0x1ea   :  { %v698_v15 = vand.u32 4294901760, %v1546_v8 }
 0x1eb   :  { %530 = vmatpush.msrb.mxu0 %v393_v40  ;;  %v650_v40 = vand.u32 4294901760, %v1455_v31  ;;  %v668_v43 = vand.u32 4294901760, %v1468_v36  ;;  %812 = vmatpush.msrb.mxu1 %v1444_v27 }
 0x1ec   :  { %v699_v53 = vsub.f32 %v1546_v8, %v698_v15 }
 0x1ed   :  { %v651_v46 = vsub.f32 %v1455_v31, %v650_v40  ;;  %v669_v56 = vsub.f32 %v1468_v36, %v668_v43  ;;  %814 = vmatpush.msrb.mxu1 %v1446_v28 }
 0x1ee   :  { %v700_v10 = vand.u32 4294901760, %v699_v53 }
 0x1ef   :  { %v652_v54 = vand.u32 4294901760, %v651_v46  ;;  %v670_v7 = vand.u32 4294901760, %v669_v56  ;;  %816 = vmatpush.msrb.mxu1 %v1464_v34 }
 0x1f0   :  { %431 = vmatmul.f32.vlgmr.msra.gmra.mxu0 %v395_v4 }
 0x1f1   :  { %751 = vmatpush.msra.mxu0 %v1455_v31  ;;  %653 = vmatpush.msra.mxu3 %v652_v54  ;;  %v710_v54 = vand.u32 4294901760, %v1562_v16 }
 0x1f2   :  { %818 = vmatpush.msrb.mxu1 %v1476_v39 }
 0x1f3   :  { %754 = vmatpush.msra.mxu0 %v1458_v32  ;;  %659 = vmatpush.msra.mxu3 %v658_v55  ;;  %v1593_v55 = vsub.f32 %v594_v5, %v1564_v17  ;;  %v1605_v5 = vand.u32 4294901760, %v591_v51 }
 0x1f4   :  { %820 = vmatpush.msrb.mxu1 %v1528_v61 }
 0x1f5   :  { %757 = vmatpush.msra.mxu0 %v1461_v33  ;;  %665 = vmatpush.msra.mxu3 %v664_v60 }
 0x1f6   :  { %822 = vmatpush.msrb.mxu1 %v1530_v62 }
 0x1f7   :  { %760 = vmatpush.msra.mxu0 %v1468_v36  ;;  %671 = vmatpush.msra.mxu3 %v670_v7 }
 0x1f8   :  { %532 = vmatmul.f32.vlgmr.msrb.gmra.mxu0 %v395_v4  ;;  %v1538_v4 = vand.u32 4294901760, %v595_v57  ;;  %824 = vmatpush.msrb.mxu1 %v1532_v63 }
 0x1f9   :  { %763 = vmatpush.msra.mxu0 %v1471_v37  ;;  %677 = vmatpush.msra.mxu3 %v676_v12  ;;  %v722_v12 = vand.u32 4294901760, %v1593_v55 }
 0x1fa   :  { %v1570_v23 = vsub.f32 %v595_v57, %v1538_v4  ;;  %630 = vmatpush.msra.mxu2 %v1538_v4  ;;  %826 = vmatpush.msrb.mxu1 %v1538_v4 }
 0x1fb   :  { %766 = vmatpush.msra.mxu0 %v1474_v38  ;;  %683 = vmatpush.msra.mxu3 %v682_v29  ;;  %v1626_v29 = vsub.f32 %v591_v51, %v1605_v5 }
 0x1fc   :  { %v716_v57 = vand.u32 4294901760, %v1570_v23  ;;  %632 = vmatpush.msra.mxu2 %v1564_v17  ;;  %828 = vmatpush.msrb.mxu1 %v1564_v17 }
 0x1fd   :  { %769 = vmatpush.msra.mxu0 %v1486_v45  ;;  %689 = vmatpush.msra.mxu3 %v688_v47  ;;  %v723_v47 = vsub.f32 %v1593_v55, %v722_v12 }
 0x1fe   :  { %v717_v13 = vsub.f32 %v1570_v23, %v716_v57  ;;  %634 = vmatpush.msra.mxu2 %v1572_v24  ;;  %830 = vmatpush.msrb.mxu1 %v1572_v24 }
 0x1ff   :  { %772 = vmatpush.msra.mxu0 %v1502_v50 }
 0x200   :  { %v718_v53 = vand.u32 4294901760, %v717_v13  ;;  %636 = vmatpush.msra.mxu2 %v1581_v48  ;;  %832 = vmatpush.msrb.mxu1 %v1581_v48 }
 0x201   :  { %775 = vmatpush.msra.mxu0 %v1546_v8 }
 0x202   :  { %638 = vmatpush.msra.mxu2 %v1605_v5  ;;  %834 = vmatpush.msrb.mxu1 %v1605_v5 }
 0x203   :  { %778 = vmatpush.msra.mxu0 %v1550_v9 }
 0x204   :  { %845 = vmatpush.msrb.mxu2 %v650_v40 }
 0x205   :  { %781 = vmatpush.msra.mxu0 %v1562_v16 }
 0x206   :  { %849 = vmatpush.msrb.mxu2 %v656_v41 }
 0x207   :  { %784 = vmatpush.msra.mxu0 %v1570_v23 }
 0x208   :  { %853 = vmatpush.msrb.mxu2 %v662_v42 }
 0x209   :  { %787 = vmatpush.msra.mxu0 %v1593_v55 }
 0x20a   :  { %857 = vmatpush.msrb.mxu2 %v668_v43 }
 0x20b   :  { %790 = vmatpush.msra.mxu0 %v1597_v58 }
 0x20c   :  { %861 = vmatpush.msrb.mxu2 %v674_v44 }
 0x20e   :  { %865 = vmatpush.msrb.mxu2 %v680_v49 }
 0x210   :  { %869 = vmatpush.msrb.mxu2 %v686_v59 }
 0x212   :  { %873 = vmatpush.msrb.mxu2 %v692_v3 }
 0x214   :  { %877 = vmatpush.msrb.mxu2 %v698_v15 }
 0x25f   :  { %v458_v11 = vpop.f32.mrf.mxu1 }
 0x263   :  { %v510_v46 = vpop.f32.mrf.mxu3 }
 0x265   :  { %v401_v35 = vpop.f32.mrf.mxu0 }
 0x267   :  { %v483_v19 = vpop.f32.mrf.mxu2 }
 0x26d   :  { %v432_v1 = vpop.f32.mrf.mxu0 }
 0x26e   :  { %v433_v6 = vadd.f32 %v432_v1, %v401_v35  ;;  %v704_v35 = vand.u32 4294901760, %v1550_v9  ;;  %v694_v1 = vand.u32 4294901760, %v693_v30 }
 0x270   :  { %v459_v14 = vadd.f32 %v458_v11, %v433_v6  ;;  %v705_v2 = vsub.f32 %v1550_v9, %v704_v35  ;;  %v1608_v6 = vsub.f32 %v592_v18, %v1581_v48  ;;  %v711_v11 = vsub.f32 %v1562_v16, %v710_v54  ;;  %695 = vmatpush.msra.mxu3 %v694_v1 }
 0x271   :  { %v724_v1 = vand.u32 4294901760, %v723_v47  ;;  %881 = vmatpush.msrb.mxu2 %v704_v35 }
 0x272   :  { %v484_v25 = vadd.f32 %v483_v19, %v459_v14  ;;  %v728_v14 = vand.u32 4294901760, %v1597_v58  ;;  %701 = vmatpush.msra.mxu3 %v700_v10  ;;  %793 = vmatpush.msra.mxu0 %v1608_v6 }
 0x273   :  { %885 = vmatpush.msrb.mxu2 %v710_v54 }
 0x274   :  { %v511_v52 = vadd.f32 %v510_v46, %v484_v25  ;;  %v706_v25 = vand.u32 4294901760, %v705_v2  ;;  %v712_v46 = vand.u32 4294901760, %v711_v11  ;;  %v729_v51 = vsub.f32 %v1597_v58, %v728_v14  ;;  %796 = vmatpush.msra.mxu0 %v1626_v29 }
 0x275   :  { %v533_v56 = vpop.f32.mrf.mxu0  ;;  %889 = vmatpush.msrb.mxu2 %v716_v57 }
 0x276   :  { %v534_v60 = vadd.f32 %v533_v56, %v511_v52  ;;  %707 = vmatpush.msra.mxu3 %v706_v25  ;;  %v740_v56 = vand.u32 4294901760, %v1626_v29 }
 0x277   :  { %893 = vmatpush.msrb.mxu2 %v722_v12 }
 0x278   :  { %v536_v7 = vperm.slane %v534_v60, 0  ;;  %v538_v19 = vperm.slane %v534_v60, 1  ;;  %713 = vmatpush.msra.mxu3 %v712_v46  ;;  %v741_v10 = vsub.f32 %v1626_v29, %v740_v56 }
 0x279   :  { %897 = vmatpush.msrb.mxu2 %v728_v14 }
 0x27a   :  { %v537_v18 = vmul.f32 %v536_v7, %v1374_v0  ;;  %v734_v0 = vand.u32 4294901760, %v1608_v6  ;;  %719 = vmatpush.msra.mxu3 %v718_v53  ;;  %v730_v7 = vand.u32 4294901760, %v729_v51  ;;  %v742_v13 = vand.u32 4294901760, %v741_v10 }
 0x27c   :  { %v539_v30 = vadd.f32 %v538_v19, %v537_v18  ;;  %v735_v2 = vsub.f32 %v1608_v6, %v734_v0  ;;  %725 = vmatpush.msra.mxu3 %v724_v1  ;;  %901 = vmatpush.msrb.mxu2 %v734_v0 }
 0x27e   :  { %v541_v52 = vmul.f32 0.01, %v539_v30  ;;  %vm540_vm8 = vcmp.ge.f32.partialorder %v539_v30, 0.0  ;;  %v736_v11 = vand.u32 4294901760, %v735_v2  ;;  %731 = vmatpush.msra.mxu3 %v730_v7  ;;  %905 = vmatpush.msrb.mxu2 %v740_v56 }
 0x280   :  { %v542_v60 = vsel %vm540_vm8, %v539_v30, %v541_v52  ;;  %737 = vmatpush.msra.mxu3 %v736_v11  ;;  %v954_v30 = vld [vmem:[%s1825_s2 + $0x3] ss:$0 sm:$0xff]  ;;  %v967_v52 = vld [vmem:[%s1825_s2 + $0x4] ss:$0 sm:$0xff] }
 0x281   :  { %1238 = vmatmul.msk.f32.vlgmr.msra.gmra.mxu1 %vm52_vm1, %v542_v60 }
 0x282   :  { %743 = vmatpush.msra.mxu3 %v742_v13 }
 0x284   :  { %912 = vmatpush.msrb.mxu3 %v1427_v20 }
 0x286   :  { %914 = vmatpush.msrb.mxu3 %v1429_v21 }
 0x288   :  { %916 = vmatpush.msrb.mxu3 %v1431_v22 }
 0x28a   :  { %918 = vmatpush.msrb.mxu3 %v1442_v26 }
 0x28c   :  { %920 = vmatpush.msrb.mxu3 %v1444_v27 }
 0x28e   :  { %922 = vmatpush.msrb.mxu3 %v1446_v28 }
 0x290   :  { %924 = vmatpush.msrb.mxu3 %v1464_v34 }
 0x292   :  { %926 = vmatpush.msrb.mxu3 %v1476_v39 }
 0x294   :  { %928 = vmatpush.msrb.mxu3 %v1528_v61 }
 0x296   :  { %930 = vmatpush.msrb.mxu3 %v1530_v62 }
 0x298   :  { %932 = vmatpush.msrb.mxu3 %v1532_v63 }
 0x29a   :  { %934 = vmatpush.msrb.mxu3 %v1538_v4 }
 0x29c   :  { %936 = vmatpush.msrb.mxu3 %v1564_v17 }
 0x29e   :  { %938 = vmatpush.msrb.mxu3 %v1572_v24 }
 0x2a0   :  { %940 = vmatpush.msrb.mxu3 %v1581_v48  ;;  %v977_v48 = vld [vmem:[%s1823_s1 + $0x2e0] sm:$0xff] }
 0x2a1   :  { %v997_v54 = vand.u32 4294901760, %v977_v48 }
 0x2a2   :  { %942 = vmatpush.msrb.mxu3 %v1605_v5 }
 0x2a3   :  { %998 = vmatpush.msrb.mxu0 %v997_v54  ;;  %v1024_v57 = vsub.f32 %v977_v48, %v997_v54 }
 0x2a5   :  { %1051 = vmatpush.msra.mxu1 %v1024_v57  ;;  %v1025_v12 = vand.u32 4294901760, %v1024_v57 }
 0x2a7   :  { %v1026_v18 = vsub.f32 %v1024_v57, %v1025_v12 }
 0x2a9   :  { %v1027_v25 = vand.u32 4294901760, %v1026_v18 }
 0x2fe   :  { %v1700_v20 = vpop.f32.mrf.mxu1 }
 0x2ff   :  { %v575_v21 = vsel %vm574_vm9, %v1700_v20, 0.0  ;;  %v582_v22 = vmul.f32 %v1700_v20, %v1700_v20 }
 0x300   :  { %v576_v26 = vrot.slane %v575_v21, 4 }
 0x301   :  { %v583_v27 = vsel %vm574_vm9, %v582_v22, 0.0  ;;  %v1165_v22 = vld [vmem:[%s1823_s1 + $0x3e0] sm:$0xff] }
 0x302   :  { %v577_v28 = vadd.f32 %v576_v26, %v575_v21  ;;  %v584_v31 = vrot.slane %v583_v27, 4  ;;  %v1166_v26 = vld [vmem:[%s1823_s1 + $0x3e8] sm:$0xff] }
 0x304   :  { %v578_v32 = vrot.slane %v577_v28, 2  ;;  %v585_v33 = vadd.f32 %v584_v31, %v583_v27  ;;  %v1163_v27 = vld [vmem:[%s1823_s1 + $0x3d0] sm:$0xff]  ;;  %v1161_v31 = vld [vmem:[%s1823_s1 + $0x3c0] sm:$0xff] }
 0x306   :  { %v579_v34 = vadd.f32 %v578_v32, %v577_v28  ;;  %v586_v36 = vrot.slane %v585_v33, 2  ;;  %v1164_v28 = vld [vmem:[%s1823_s1 + $0x3d8] sm:$0xff]  ;;  %v1162_v32 = vld [vmem:[%s1823_s1 + $0x3c8] sm:$0xff] }
 0x308   :  { %v580_v37 = vrot.slane %v579_v34, 1  ;;  %v587_v38 = vadd.f32 %v586_v36, %v585_v33  ;;  %v1159_v33 = vld [vmem:[%s1823_s1 + $0x3b0] sm:$0xff]  ;;  %v1157_v36 = vld [vmem:[%s1823_s1 + $0x3a0] sm:$0xff] }
 0x30a   :  { %v588_v39 = vrot.slane %v587_v38, 1  ;;  %v581_v40 = vadd.f32 %v580_v37, %v579_v34  ;;  %v1160_v34 = vld [vmem:[%s1823_s1 + $0x3b8] sm:$0xff]  ;;  %v1158_v37 = vld [vmem:[%s1823_s1 + $0x3a8] sm:$0xff] }
 0x30c   :  { %v589_v41 = vadd.f32 %v588_v39, %v587_v38  ;;  %v1155_v38 = vld [vmem:[%s1823_s1 + $0x390] sm:$0xff]  ;;  %v1156_v39 = vld [vmem:[%s1823_s1 + $0x398] sm:$0xff] }
 0x30e   :  { %v590_v42 = vsel %vm92_vm3, %v581_v40, %v589_v41  ;;  %v1153_v40 = vld [vmem:[%s1823_s1 + $0x380] sm:$0xff]  ;;  %v1154_v41 = vld [vmem:[%s1823_s1 + $0x388] sm:$0xff] }
 0x30f   :  { %v639_v43 = vand.u32 4294901760, %v590_v42 }
 0x311   :  { %745 = vmatmul.f32.vlgmr.msra.gmra.mxu3 %v639_v43  ;;  %v640_v44 = vsub.f32 %v590_v42, %v639_v43  ;;  %v1151_v42 = vld [vmem:[%s1823_s1 + $0x370] sm:$0xff] }
 0x313   :  { %799 = vmatmul.f32.vlgmr.msra.gmra.mxu0 %v640_v44  ;;  %v641_v45 = vand.u32 4294901760, %v640_v44 }
 0x314   :  { %1028 = vmatpush.msra.mxu0 %v1027_v25 }
 0x315   :  { %838 = vmatmul.f32.vlgmr.msrb.gmra.mxu1 %v641_v45  ;;  %v642_v49 = vsub.f32 %v640_v44, %v641_v45  ;;  %v1149_v44 = vld [vmem:[%s1823_s1 + $0x360] sm:$0xff]  ;;  %v1150_v45 = vld [vmem:[%s1823_s1 + $0x368] sm:$0xff] }
 0x316   :  { %1100 = vmatpush.msrb.mxu1 %v1025_v12 }
 0x317   :  { %v643_v50 = vand.u32 4294901760, %v642_v49  ;;  %v1147_v49 = vld [vmem:[%s1823_s1 + $0x350] sm:$0xff] }
 0x319   :  { %644 = vmatmul.f32.vlgmr.msra.gmra.mxu2 %v643_v50  ;;  %944 = vmatmul.f32.vlgmr.msrb.gmra.mxu3 %v639_v43  ;;  %v1148_v50 = vld [vmem:[%s1823_s1 + $0x358] sm:$0xff] }
 0x31a   :  { %1194 = vmatpush.msra.mxu2 %v1166_v26 }
 0x31c   :  { %1195 = vmatpush.msra.mxu2 %v1164_v28 }
 0x31e   :  { %1196 = vmatpush.msra.mxu2 %v1162_v32 }
 0x320   :  { %1197 = vmatpush.msra.mxu2 %v1160_v34 }
 0x321   :  { %907 = vmatmul.f32.vlgmr.msrb.gmra.mxu2 %v639_v43  ;;  %v1152_v43 = vld [vmem:[%s1823_s1 + $0x378] sm:$0xff] }
 0x322   :  { %1198 = vmatpush.msra.mxu2 %v1158_v37 }
 0x324   :  { %1199 = vmatpush.msra.mxu2 %v1156_v39 }
 0x326   :  { %1200 = vmatpush.msra.mxu2 %v1154_v41 }
 0x328   :  { %1201 = vmatpush.msra.mxu2 %v1152_v43 }
 0x32a   :  { %1202 = vmatpush.msra.mxu2 %v1150_v45 }
 0x32c   :  { %1203 = vmatpush.msra.mxu2 %v1148_v50 }
 0x390   :  { %v800_v63 = vpop.f32.mrf.mxu0 }
 0x392   :  { %v839_v4 = vpop.f32.mrf.mxu1 }
 0x394   :  { %v746_v59 = vpop.f32.mrf.mxu3 }
 0x39c   :  { %v645_v61 = vpop.f32.mrf.mxu2  ;;  %v945_v16 = vpop.f32.mrf.mxu3 }
 0x39d   :  { %v747_v62 = vadd.f32 %v746_v59, %v645_v61  ;;  %v1145_v59 = vld [vmem:[%s1823_s1 + $0x340] sm:$0xff]  ;;  %v1146_v61 = vld [vmem:[%s1823_s1 + $0x348] sm:$0xff] }
 0x39e   :  { %1204 = vmatpush.msra.mxu2 %v1146_v61 }
 0x39f   :  { %v801_v3 = vadd.f32 %v800_v63, %v747_v62  ;;  %v1143_v62 = vld [vmem:[%s1823_s1 + $0x330] sm:$0xff]  ;;  %v1144_v63 = vld [vmem:[%s1823_s1 + $0x338] sm:$0xff] }
 0x3a0   :  { %1205 = vmatpush.msra.mxu2 %v1144_v63 }
 0x3a1   :  { %v840_v8 = vadd.f32 %v839_v4, %v801_v3  ;;  %v1141_v3 = vld [vmem:[%s1823_s1 + $0x320] sm:$0xff]  ;;  %v1142_v4 = vld [vmem:[%s1823_s1 + $0x328] sm:$0xff] }
 0x3a2   :  { %1206 = vmatpush.msra.mxu2 %v1142_v4 }
 0x3a4   :  { %v908_v9 = vpop.f32.mrf.mxu2 }
 0x3a5   :  { %v909_v15 = vadd.f32 %v908_v9, %v840_v8  ;;  %v1139_v8 = vld [vmem:[%s1823_s1 + $0x310] sm:$0xff]  ;;  %v1140_v9 = vld [vmem:[%s1823_s1 + $0x318] sm:$0xff] }
 0x3a6   :  { %1207 = vmatpush.msra.mxu2 %v1140_v9 }
 0x3a7   :  { %v946_v17 = vadd.f32 %v945_v16, %v909_v15  ;;  %v1137_v15 = vld [vmem:[%s1823_s1 + $0x300] sm:$0xff]  ;;  %v1138_v16 = vld [vmem:[%s1823_s1 + $0x308] sm:$0xff] }
 0x3a8   :  { %1208 = vmatpush.msra.mxu2 %v1138_v16 }
 0x3a9   :  { %v948_v23 = vmul.f32 0.03125, %v946_v17 }
 0x3ab   :  { %v949_v24 = vmul.f32 %v948_v23, %v948_v23 }
 0x3ad   :  { %v951_v35 = vrot.slane %v949_v24, 7  ;;  %v1136_v24 = vld [vmem:[%s1823_s1 + $0x2f8] sm:$0xff] }
 0x3ae   :  { %1209 = vmatpush.msra.mxu2 %v1136_v24 }
 0x3af   :  { %v953_v55 = vsub.f32 %v948_v23, %v951_v35 }
 0x3b1   :  { %v955_v58 = vadd.f32 1e-05, %v953_v55 }
 0x3b3   :  { %1242 = vrsqrt.f32 %v955_v58  ;;  %vm962_vm11 = vweird.f32 %v955_v58 }
 0x3b9   :  { %v1243_v5 = vpop.eup %1242 }
 0x3ba   :  { %v957_v6 = vmul.f32 %v1243_v5, %v955_v58  ;;  %vm963_vm10 = vweird.f32 %v1243_v5 }
 0x3bb   :  { %vm964_vm12 = vmor %vm962_vm11, %vm963_vm10 }
 0x3bc   :  { %v958_v14 = vmul.f32 %v1243_v5, %v957_v6 }
 0x3be   :  { %v959_v19 = vmul.f32 0.5, %v958_v14 }
 0x3c0   :  { %v960_v29 = vsub.f32 1.5, %v959_v19 }
 0x3c2   :  { %v961_v46 = vmul.f32 %v1243_v5, %v960_v29 }
 0x3c4   :  { %v965_v47 = vsel %vm964_vm12, %v1243_v5, %v961_v46 }
 0x3c5   :  { %v966_v0 = vmul.f32 %v965_v47, %v954_v30  ;;  %v1239_v47 = vld [vmem:[%s1825_s2 + $0x5] ss:$8 sm:$0x3] }
 0x3c7   :  { %v969_v51 = vrot.slane %v966_v0, 1  ;;  %v1170_v0 = vperm.slane %v1239_v47, 0 }
 0x3c9   :  { %v971_v53 = vmul.f32 %v969_v51, %v948_v23  ;;  %v1135_v23 = vld [vmem:[%s1823_s1 + $0x2f0] sm:$0xff] }
 0x3cb   :  { %v972_v56 = vsub.f32 %v967_v52, %v971_v53 }
 0x3cd   :  { %v974_v60 = vrot.slane %v972_v56, 7  ;;  %v1171_v56 = vperm.slane %v1239_v47, 1 }
 0x3cf   :  { %v976_v1 = vsel %vm92_vm3, %v969_v51, %v974_v60 }
 0x3d0   :  { %v980_v2 = vsel %vm978_vm13, %v976_v1, 0 }
 0x3d1   :  { %v999_v7 = vand.u32 4294901760, %v980_v2 }
 0x3d3   :  { %v1000_v10 = vsub.f32 %v980_v2, %v999_v7 }
 0x3d5   :  { %1054 = vmatmul.f32.vlgmr.msra.gmra.mxu1 %v1000_v10  ;;  %v1001_v11 = vand.u32 4294901760, %v1000_v10 }
 0x3d6   :  { %1174 = vmatpush.msra.mxu1 %v1165_v22 }
 0x3d7   :  { %v1002_v13 = vsub.f32 %v1000_v10, %v1001_v11 }
 0x3d8   :  { %1175 = vmatpush.msra.mxu1 %v1163_v27 }
 0x3d9   :  { %v1003_v21 = vand.u32 4294901760, %v1002_v13 }
 0x3da   :  { %1176 = vmatpush.msra.mxu1 %v1161_v31 }
 0x3db   :  { %1004 = vmatmul.f32.vlgmr.msrb.gmra.mxu0 %v1003_v21 }
 0x3dc   :  { %1074 = vmatpush.msrb.mxu0 %v997_v54  ;;  %1177 = vmatpush.msra.mxu1 %v1159_v33 }
 0x3dd   :  { %1102 = vmatmul.f32.vlgmr.msrb.gmra.mxu1 %v999_v7 }
 0x3de   :  { %1178 = vmatpush.msra.mxu1 %v1157_v36 }
 0x3e0   :  { %1179 = vmatpush.msra.mxu1 %v1155_v38 }
 0x3e2   :  { %1180 = vmatpush.msra.mxu1 %v1153_v40 }
 0x3e3   :  { %1030 = vmatmul.f32.vlgmr.msra.gmra.mxu0 %v999_v7 }
 0x3e4   :  { %1122 = vmatpush.msra.mxu0 %v997_v54  ;;  %1181 = vmatpush.msra.mxu1 %v1151_v42 }
 0x3e6   :  { %1182 = vmatpush.msra.mxu1 %v1149_v44 }
 0x3e8   :  { %1183 = vmatpush.msra.mxu1 %v1147_v49 }
 0x3ea   :  { %1184 = vmatpush.msra.mxu1 %v1145_v59 }
 0x3eb   :  { %1078 = vmatmul.f32.vlgmr.msrb.gmra.mxu0 %v1001_v11 }
 0x3ec   :  { %1185 = vmatpush.msra.mxu1 %v1143_v62 }
 0x3ee   :  { %1186 = vmatpush.msra.mxu1 %v1141_v3 }
 0x3f0   :  { %1187 = vmatpush.msra.mxu1 %v1139_v8 }
 0x3f2   :  { %1188 = vmatpush.msra.mxu1 %v1137_v15 }
 0x3f3   :  { %1124 = vmatmul.f32.vlgmr.msra.gmra.mxu0 %v999_v7 }
 0x3f4   :  { %1189 = vmatpush.msra.mxu1 %v1135_v23 }
 0x452   :  { %v1055_v48 = vpop.f32.mrf.mxu1 }
 0x458   :  { %v1005_v17 = vpop.f32.mrf.mxu0 }
 0x45a   :  { %v1103_v5 = vpop.f32.mrf.mxu1 }
 0x460   :  { %v1031_v35 = vpop.f32.mrf.mxu0 }
 0x461   :  { %v1032_v54 = vadd.f32 %v1031_v35, %v1005_v17 }
 0x463   :  { %v1056_v57 = vadd.f32 %v1055_v48, %v1032_v54 }
 0x468   :  { %v1079_v55 = vpop.f32.mrf.mxu0 }
 0x469   :  { %v1080_v58 = vadd.f32 %v1079_v55, %v1056_v57 }
 0x46b   :  { %v1104_v6 = vadd.f32 %v1103_v5, %v1080_v58 }
 0x470   :  { %v1125_v12 = vpop.f32.mrf.mxu0 }
 0x471   :  { %v1126_v14 = vadd.f32 %v1125_v12, %v1104_v6 }
 0x473   :  { %v1128_v18 = vperm.slane %v1126_v14, 0  ;;  %v1130_v25 = vperm.slane %v1126_v14, 1 }
 0x475   :  { %v1129_v19 = vmul.f32 %v1128_v18, %v1700_v20 }
 0x477   :  { %v1131_v29 = vadd.f32 %v1130_v25, %v1129_v19 }
 0x479   :  { %vm1132_vm14 = vcmp.ge.f32.partialorder %v1131_v29, 0.0  ;;  %v1133_v30 = vmul.f32 0.01, %v1131_v29 }
 0x47b   :  { %v1134_v46 = vsel %vm1132_vm14, %v1131_v29, %v1133_v30 }
 0x47c   :  { %1190 = vmatmul.f32.vlgmr.msra.gmra.mxu1 %v1134_v46  ;;  %1210 = vmatmul.f32.vlgmr.msra.gmra.mxu2 %v1134_v46 }
 0x4f9   :  { %v1191_v51 = vpop.f32.mrf.mxu1 }
 0x4fa   :  { %v1192_v52 = vadd.f32 %v1191_v51, %v1170_v0 }
 0x4fc   :  { %v1214_v53 = vsub.f32 0.0, %v1192_v52 }
 0x4fe   :  { %v1216_v1 = vmul.f32 1.442695, %v1214_v53 }
 0x4ff   :  { %v1211_v60 = vpop.f32.mrf.mxu2 }
 0x500   :  { %v1212_v2 = vadd.f32 %v1211_v60, %v1171_v56  ;;  %1244 = vpow2.f32 %v1216_v1 }
 0x502   :  { %v1215_v20 = vsub.f32 0.0, %v1212_v2 }
 0x504   :  { %v1218_v7 = vmul.f32 1.442695, %v1215_v20 }
 0x506   :  { %1246 = vpow2.f32 %v1218_v7  ;;  %v1245_v10 = vpop.eup %1244 }
 0x507   :  { %v1220_v13 = vadd.f32 1.0, %v1245_v10 }
 0x50c   :  { %v1247_v11 = vpop.eup %1246 }
 0x50d   :  { %v1221_v21 = vadd.f32 1.0, %v1247_v11 }
 0x50f   :  { %1248 = vrcp.f32 %v1221_v21 }
 0x510   :  { %1250 = vrcp.f32 %v1220_v13 }
 0x515   :  { %v1249_v22 = vpop.eup %1248 }
 0x516   :  { %v1226_v26 = vrot.slane %v1249_v22, 6  ;;  %v1251_v27 = vpop.eup %1250 }
 0x518   :  { %v1227_v28 = vsel %vm574_vm9, %v1251_v27, %v1226_v26 }
 0x519   :  { %1231 = vst.msk [vmem:[%s1826_s3] sm:$0xf] %vm1230_vm0, %v1227_v28 }

</bundles_post_ra>
